<compile_context>
chip_gen: v7x
topology: tpu7x:2x2x1
jax: 0.10.0
libtpu: 0.0.40
codegen_flags: <defaults>
</compile_context>

<pallas_src>
import functools

import jax
import jax.numpy as jnp
from jax.experimental import pallas as pl
from jax.experimental.pallas import tpu as pltpu


def _cdiv(a, b):
    return -(-a // b)


def _tensorcores_per_chip():
    """Best-effort: 2 TensorCores per chip on v4 / v7x (megacore); 1 on v5e/v6e."""
    try:
        kind = jax.devices()[0].device_kind.lower()
    except Exception:
        return 1
    return 2 if ("v7" in kind or "7x" in kind or "v4" in kind) else 1


def _focal_loss_kernel(x_ref, t_ref, o_ref, acc_ref, *, gamma, eps,
                       block_rows, lane, n_rows, tiles_per_core, may_need_mask):
    """Accumulate sum(weight * log(x) * t) over this core's row tiles.

    x_ref, t_ref : VMEM (block_rows, lane) probabilities / targets
    o_ref        : SMEM (1, 1) per-core partial sum (written on last step, negated)
    acc_ref      : VMEM (8, lane) [or (block_rows, lane) for tiny blocks] f32 accumulator
    """
    i = pl.program_id(1)

    @pl.when(i == 0)
    def _init():
        acc_ref[...] = jnp.zeros_like(acc_ref)

    x = x_ref[...].astype(jnp.float32)
    t = t_ref[...].astype(jnp.float32)

    # contrib = weight * log(x) * t ; the (-) of log_probs is applied at finalize.
    logx = jnp.log(x)

    g = float(gamma)
    if g == 0.0:
        contrib = logx * t
    else:
        base = jnp.float32(1.0 + eps) - x          # one VALU op instead of two
        if g.is_integer() and 1.0 <= g <= 8.0:
            weight = base
            for _ in range(int(g) - 1):
                weight = weight * base             # VPU multiplies, no EUP pressure
        else:
            weight = jnp.exp(jnp.float32(g) * jnp.log(base))   # arbitrary float gamma
        contrib = weight * logx * t

    if block_rows % 8 == 0:
        def _reduce(c):
            # (R, L) -> (R/8, 8, L) matches the vreg tiling exactly, so the reshape
            # is layout-preserving and the sum over axis 0 is pure VALU vreg adds.
            return c.reshape(block_rows // 8, 8, lane).sum(axis=0)
    else:
        def _reduce(c):   # tiny single-tile case only
            return c

    if may_need_mask:
        p = pl.program_id(0)
        row_start = (p * tiles_per_core + i) * block_rows
        is_full = row_start + block_rows <= n_rows

        @pl.when(is_full)
        def _full_tile():                          # unmasked fast path
            acc_ref[...] += _reduce(contrib)

        @pl.when(jnp.logical_not(is_full))
        def _partial_tile():
            # Partial / over-allocated tile: discard garbage rows.  jnp.where is a
            # select, so NaNs from log(garbage) are discarded, never multiplied.
            row_ids = jax.lax.broadcasted_iota(jnp.int32, contrib.shape, 0) + row_start
            acc_ref[...] += _reduce(jnp.where(row_ids < n_rows, contrib, 0.0))
    else:
        acc_ref[...] += _reduce(contrib)

    @pl.when(i == pl.num_programs(1) - 1)
    def _finalize():
        # One small XLU reduce; apply the log_probs negation here.
        o_ref[0, 0] = -jnp.sum(acc_ref[...])


def focal_loss(inputs, target, *, gamma=1.0, eps=1e-6, block_bytes=4 << 20):
    """inputs, target: (B, C, ...) float arrays; loss is mean over non-channel dims."""
    assert inputs.shape == target.shape
    assert inputs.ndim >= 2
    C = inputs.shape[1]
    total = inputs.size
    n_positions = total // C  # number of (batch, spatial) positions averaged over

    x_flat = inputs.reshape(-1)
    t_flat = target.reshape(-1)

    # Pick a lane width that divides the flat length -> reshape only, no copy.
    lane = None
    for cand in (512, 256, 128):
        if total % cand == 0:
            lane = cand
            break
    if lane is None:
        # Rare path (flat length not a multiple of 128): pad x with 1.0 and t with
        # 0.0 so padded elements contribute exactly 0 (and no -log(0) NaN).
        # TODO(synk): a 1-D-blocked kernel with in-kernel tail masking would avoid
        # this extra HBM pass; kept simple since the path is rare and small.
        lane = 128
        padded_total = _cdiv(total, lane) * lane
        pad = padded_total - total
        x_flat = jnp.pad(x_flat, (0, pad), constant_values=1.0)
        t_flat = jnp.pad(t_flat, (0, pad), constant_values=0.0)
    else:
        padded_total = total

    n_rows = padded_total // lane

    # ~block_bytes (default 4 MiB) of f32 per input block.  2 inputs x 2 pipeline
    # buffers = 16 MiB plus a tiny (8, lane) accumulator; vmem_limit_bytes is set
    # explicitly below so this fits every generation with headroom.
    br_cap = max(8, block_bytes // (lane * 4))
    br_cap -= br_cap % 8            # keep divisible by 8 for the (8, lane) accumulator
    block_rows = br_cap if n_rows >= br_cap else n_rows

    x2 = x_flat.reshape(n_rows, lane)
    t2 = t_flat.reshape(n_rows, lane)

    n_tiles = _cdiv(n_rows, block_rows)
    # Split row tiles across TensorCores only on multi-TC chips (v4 / v7x megacore);
    # on 1-TC chips (v5e / v6e) keep a single serial axis of size 1.
    n_split = 2 if (_tensorcores_per_chip() == 2 and n_tiles >= 2) else 1
    tiles_per_core = _cdiv(n_tiles, n_split)
    may_need_mask = (n_rows % block_rows != 0) or (n_split * tiles_per_core != n_tiles)
    last_tile = n_tiles - 1

    def in_index_map(s, i):
        tile = s * tiles_per_core + i
        # Clamp so over-allocated (fully masked) steps still DMA in-bounds.
        return (jnp.minimum(tile, last_tile), 0)

    acc_rows = 8 if block_rows % 8 == 0 else block_rows

    kernel = functools.partial(
        _focal_loss_kernel,
        gamma=float(gamma),
        eps=float(eps),
        block_rows=block_rows,
        lane=lane,
        n_rows=n_rows,
        tiles_per_core=tiles_per_core,
        may_need_mask=may_need_mask,
    )

    # Explicit scoped-VMEM budget: 2 inputs x 2 buffers x block + headroom, floored
    # at 32 MiB (above v5e's 16 MiB default) and capped at 48 MiB (under v7x's
    # 64 MiB physical).
    in_bytes = block_rows * lane * x2.dtype.itemsize
    vmem_limit = int(min(48 << 20, max(32 << 20, 4 * in_bytes + (6 << 20))))

    partials = pl.pallas_call(
        kernel,
        out_shape=jax.ShapeDtypeStruct((n_split, 1), jnp.float32),
        grid_spec=pltpu.PrefetchScalarGridSpec(
            num_scalar_prefetch=0,
            grid=(n_split, tiles_per_core),
            in_specs=[
                pl.BlockSpec((block_rows, lane), in_index_map),
                pl.BlockSpec((block_rows, lane), in_index_map),
            ],
            out_specs=pl.BlockSpec(
                (1, 1), lambda s, i: (s, 0), memory_space=pltpu.SMEM
            ),
            scratch_shapes=[pltpu.VMEM((acc_rows, lane), jnp.float32)],
        ),
        compiler_params=pltpu.CompilerParams(
            dimension_semantics=("parallel", "arbitrary"),
            vmem_limit_bytes=vmem_limit,
        ),
    )(x2, t2)

    return jnp.sum(partials) / jnp.float32(n_positions)


def focal_loss_ref(inputs, target, *, gamma=1.0, eps=1e-6):
    """Pure-JAX reference mirroring the PyTorch forward exactly."""
    log_probs = -jnp.log(inputs)
    fl = jnp.sum(jnp.power(1.0 - inputs + eps, gamma) * log_probs * target, axis=1)
    return jnp.mean(fl)


if __name__ == "__main__":
    key = jax.random.PRNGKey(0)

    def make_case(k, shape):
        k1, k2 = jax.random.split(k)
        logits = jax.random.normal(k1, shape, dtype=jnp.float32)
        probs = jax.nn.softmax(logits, axis=1)        # probabilities in (0, 1]
        tgt = jax.random.uniform(k2, shape, dtype=jnp.float32)
        return probs, tgt

    keys = jax.random.split(key, 4)
    checks = []

    # Primary small NCHW case (matches the module's usage).
    probs, tgt = make_case(keys[0], (2, 4, 16, 16))
    checks.append((focal_loss(probs, tgt, gamma=1.0), focal_loss_ref(probs, tgt, gamma=1.0)))
    # Integer gamma > 1 (VPU-multiply path), gamma == 0, and non-integer gamma.
    checks.append((focal_loss(probs, tgt, gamma=2.0), focal_loss_ref(probs, tgt, gamma=2.0)))
    checks.append((focal_loss(probs, tgt, gamma=0.0), focal_loss_ref(probs, tgt, gamma=0.0)))
    checks.append((focal_loss(probs, tgt, gamma=1.5), focal_loss_ref(probs, tgt, gamma=1.5)))

    # Multi-tile case with small blocks: exercises the (8, lane) accumulator, the
    # masked partial last tile, and (on 2-TC chips) the clamped over-allocated tile.
    probs2, tgt2 = make_case(keys[1], (4, 8, 64, 72))
    checks.append((focal_loss(probs2, tgt2, gamma=1.0, block_bytes=128 * 1024),
                   focal_loss_ref(probs2, tgt2, gamma=1.0)))

    # Moderate case on the default (4 MiB) block size.
    probs3, tgt3 = make_case(keys[2], (5, 8, 128, 128))
    checks.append((focal_loss(probs3, tgt3, gamma=1.0), focal_loss_ref(probs3, tgt3, gamma=1.0)))

    # Flat length not a multiple of 128 -> rare padded fallback path.
    probs4, tgt4 = make_case(keys[3], (2, 3, 17, 23))
    checks.append((focal_loss(probs4, tgt4, gamma=1.0), focal_loss_ref(probs4, tgt4, gamma=1.0)))

    for got, want in checks:
        got = jax.block_until_ready(got)
        assert jnp.allclose(got, want, rtol=1e-5, atol=1e-6), (got, want)

    print("KERNEL_OK")
</pallas_src>

<mosaic_0001>
module attributes {stable_mosaic.version = 11 : i64} {
  func.func @_focal_loss_kernel(%arg0: i32, %arg1: i32, %arg2: memref<4x512xf32, #tpu.memory_space<vmem>>, %arg3: memref<4x512xf32, #tpu.memory_space<vmem>>, %arg4: memref<1x1xf32, #tpu.memory_space<smem>>, %arg5: memref<4x512xf32, #tpu.memory_space<vmem>>) attributes {dimension_semantics = [#tpu.dimension_semantics<parallel>, #tpu.dimension_semantics<arbitrary>], iteration_bounds = array<i64: 1, 1>, scalar_prefetch = 0 : i64, scratch_operands = 1 : i64, tpu.core_type = #tpu.core_type<tc>, window_params = [{transform_indices = @transform_0, window_bounds = array<i64: 4, 512>}, {transform_indices = @transform_1, window_bounds = array<i64: 4, 512>}, {transform_indices = @transform_2, window_bounds = array<i64: 1, 1>}]} {
    %c0_i32 = arith.constant 0 : i32
    %0 = arith.cmpi eq, %arg1, %c0_i32 : i32
    %1 = arith.extui %0 : i1 to i32
    %c0_i32_0 = arith.constant 0 : i32
    %2 = arith.cmpi ne, %1, %c0_i32_0 : i32
    scf.if %2 {
      %cst_10 = arith.constant 0.000000e+00 : f32
      %16 = vector.broadcast %cst_10 : f32 to vector<4x512xf32>
      %c0_11 = arith.constant 0 : index
      %c0_12 = arith.constant 0 : index
      %17 = vector.load %arg5[%c0_11, %c0_12] : memref<4x512xf32, #tpu.memory_space<vmem>>, vector<4x512xf32>
      tpu.vector_store %arg5[%c0_11, %c0_12], %16 {strides = array<i32>} : memref<4x512xf32, #tpu.memory_space<vmem>>, vector<4x512xf32>,
    } else {
    }
    %c0 = arith.constant 0 : index
    %c0_1 = arith.constant 0 : index
    %3 = vector.load %arg2[%c0, %c0_1] : memref<4x512xf32, #tpu.memory_space<vmem>>, vector<4x512xf32>
    %c0_2 = arith.constant 0 : index
    %c0_3 = arith.constant 0 : index
    %4 = vector.load %arg3[%c0_2, %c0_3] : memref<4x512xf32, #tpu.memory_space<vmem>>, vector<4x512xf32>
    %5 = math.log %3 : vector<4x512xf32>
    %cst = arith.constant 1.00000095 : f32
    %6 = vector.broadcast %cst : f32 to vector<4x512xf32>
    %7 = arith.subf %6, %3 : vector<4x512xf32>
    %8 = arith.mulf %7, %5 : vector<4x512xf32>
    %9 = arith.mulf %8, %4 : vector<4x512xf32>
    %c0_4 = arith.constant 0 : index
    %c0_5 = arith.constant 0 : index
    %10 = vector.load %arg5[%c0_4, %c0_5] : memref<4x512xf32, #tpu.memory_space<vmem>>, vector<4x512xf32>
    %11 = arith.addf %10, %9 : vector<4x512xf32>
    %c0_6 = arith.constant 0 : index
    %c0_7 = arith.constant 0 : index
    %12 = vector.load %arg5[%c0_6, %c0_7] : memref<4x512xf32, #tpu.memory_space<vmem>>, vector<4x512xf32>
    tpu.vector_store %arg5[%c0_6, %c0_7], %11 {strides = array<i32>} : memref<4x512xf32, #tpu.memory_space<vmem>>, vector<4x512xf32>,
    %c0_i32_8 = arith.constant 0 : i32
    %13 = arith.cmpi eq, %arg1, %c0_i32_8 : i32
    %14 = arith.extui %13 : i1 to i32
    %c0_i32_9 = arith.constant 0 : i32
    %15 = arith.cmpi ne, %14, %c0_i32_9 : i32
    scf.if %15 {
      %c0_10 = arith.constant 0 : index
      %c0_11 = arith.constant 0 : index
      %16 = vector.load %arg5[%c0_10, %c0_11] : memref<4x512xf32, #tpu.memory_space<vmem>>, vector<4x512xf32>
      %17 = vector.shape_cast %16 : vector<4x512xf32> to vector<1x4x512xf32>
      %cst_12 = arith.constant dense<0.000000e+00> : vector<1xf32>
      %18 = vector.multi_reduction <add>, %17, %cst_12 [1, 2] : vector<1x4x512xf32> to vector<1xf32>
      %19 = vector.shape_cast %18 : vector<1xf32> to vector<1x1x1xf32>
      %20 = vector.extract %19[0, 0, 0] : f32 from vector<1x1x1xf32>
      %cst_13 = arith.constant 0.000000e+00 : f32
      %21 = arith.subf %cst_13, %20 : f32
      %c0_14 = arith.constant 0 : index
      %c0_15 = arith.constant 0 : index
      %22 = memref.load %arg4[%c0_14, %c0_15] : memref<1x1xf32, #tpu.memory_space<smem>>
      memref.store %21, %arg4[%c0_14, %c0_15] : memref<1x1xf32, #tpu.memory_space<smem>>
    } else {
    }
    return
  }
  func.func @transform_0(%arg0: i32, %arg1: i32) -> (i32, i32) {
    %c1_i32 = arith.constant 1 : i32
    %0 = arith.muli %arg0, %c1_i32 : i32
    %1 = arith.addi %0, %arg1 : i32
    %c0_i32 = arith.constant 0 : i32
    %2 = arith.minsi %1, %c0_i32 : i32
    %c0_i32_0 = arith.constant 0 : i32
    %c0_i32_1 = arith.constant 0 : i32
    return %2, %c0_i32_0 : i32, i32
  }
  func.func @transform_1(%arg0: i32, %arg1: i32) -> (i32, i32) {
    %c1_i32 = arith.constant 1 : i32
    %0 = arith.muli %arg0, %c1_i32 : i32
    %1 = arith.addi %0, %arg1 : i32
    %c0_i32 = arith.constant 0 : i32
    %2 = arith.minsi %1, %c0_i32 : i32
    %c0_i32_0 = arith.constant 0 : i32
    %c0_i32_1 = arith.constant 0 : i32
    return %2, %c0_i32_0 : i32, i32
  }
  func.func @transform_2(%arg0: i32, %arg1: i32) -> (i32, i32) {
    %c0_i32 = arith.constant 0 : i32
    %c0_i32_0 = arith.constant 0 : i32
    return %arg0, %c0_i32 : i32, i32
  }
}

</mosaic_0001>

<bundles_post_ra>
// kernel: tpu_custom_call.1
= control target key start
LH: loop header
LB: loop body
LE: loop exit
PB: predicated region body
PF: predicated region fallthrough
CT: control target
= control target key end

     0   :  { %7 = vsyncpa [#allocation4], 0  ;;  %s253_s0 = inlined_call_operand.hbm [shape: f32[4,512], index: 0, kind: input, shape index: {}]   ;;  %s254_s1 = inlined_call_operand.hbm [shape: f32[4,512], index: 1, kind: input, shape index: {}]   ;;  %s255_s2 = inlined_call_operand.hbm [shape: f32[1,1], index: 2, kind: output, shape index: {}]  }
   0x1   :  { %8 = vsyncpa [#allocation7], 0 }
   0x2   :  { %9 = vsyncpa [#allocation5], 0  ;;  %s199_s9 = smov [#allocation3]   ;;  %s200_s11 = smov [#allocation6]  }
   0x3   :  { %s22_s10 = sshll.u32 %s199_s9, 4  ;;  %s38_s12 = sshll.u32 %s200_s11, 4  ;;  %s23_s10 = int_to_ptr.vmem [resolvable:$true] %s22_s10  ;;  %s39_s12 = int_to_ptr.vmem [resolvable:$true] %s38_s12 }
   0x4   :  { %s139_s15 = scalar_lea.hbm %s253_s0, 256 }
   0x5   :  { %p140_p0 = scmp.ne.s32.totalorder %s253_s0, %s139_s15  ;;  %p143_p1 = scmp.lt.u32.totalorder %s139_s15, %s253_s0 }
   0x7   :  { %p145_p2 = pnand %p143_p1, %p140_p0 }
   0x9   :  { %148 = shalt.err (!%p145_p2)
}
   0xa   :  { %s149_s20 = scalar_lea.vmem %s23_s10, 256  ;;  %p154_p4 = scmp.lt.s32.totalorder %s23_s10, %s23_s10 }
   0xb   :  { %p150_p3 = scmp.ne.s32.totalorder %s23_s10, %s149_s20  ;;  %p155_p5 = scmp.lt.s32.totalorder %s149_s20, %s149_s20 }
   0xd   :  { %p156_p6 = por %p155_p5, %p154_p4 }
   0xf   :  { %p157_p7 = pnand %p156_p6, %p150_p3 }
  0x11   :  { %160 = shalt.err (!%p157_p7)
}
  0x12   :  { %25 = dma.hbm_to_vmem [thread:$0]  %s253_s0, 256, %s23_s10, [#allocation4]  }
  0x13   :  { %s161_s25 = scalar_lea.hbm %s254_s1, 256 }
  0x14   :  { %p162_p8 = scmp.ne.s32.totalorder %s254_s1, %s161_s25  ;;  %p165_p9 = scmp.lt.u32.totalorder %s161_s25, %s254_s1 }
  0x16   :  { %p167_p10 = pnand %p165_p9, %p162_p8 }
  0x18   :  { %170 = shalt.err (!%p167_p10)
}
  0x19   :  { %s171_s30 = scalar_lea.vmem %s39_s12, 256  ;;  %p176_p12 = scmp.lt.s32.totalorder %s39_s12, %s39_s12 }
  0x1a   :  { %p172_p11 = scmp.ne.s32.totalorder %s39_s12, %s171_s30  ;;  %p177_p13 = scmp.lt.s32.totalorder %s171_s30, %s171_s30 }
  0x1c   :  { %p178_p0 = por %p177_p13, %p176_p12 }
  0x1e   :  { %p179_p1 = pnand %p178_p0, %p172_p11 }
  0x20   :  { %182 = shalt.err (!%p179_p1)
}
  0x21   :  { %41 = dma.hbm_to_vmem [thread:$0]  %s254_s1, 256, %s39_s12, [#allocation7]  }
  0x22   :  { %193 = dma.done.wait [#allocation4], 256  }
  0x23   :  { %194 = vsyncadd [#allocation4], 4294967040 }
  0x24   :  { %195 = dma.done.wait [#allocation7], 256  }
  0x25   :  { %196 = vsyncadd [#allocation7], 4294967040  ;;  %v60_v0 = vld [vmem:[#allocation3] sm:$0xff]  ;;  %v61_v1 = vld [vmem:[#allocation3 + $0x8] sm:$0xff]  ;;  %vm91_vm0 = vcmask 1043456   ;;  %s183_s7 = scalar_lea.hbm %s255_s2, 16 }
  0x26   :  { %135 = vlog2.f32 %v60_v0  ;;  %v68_v2 = vsub.f32 1.000001, %v60_v0  ;;  %v69_v4 = vsub.f32 1.000001, %v61_v1  ;;  %v62_v7 = vld [vmem:[#allocation6] sm:$0xff]  ;;  %v63_v9 = vld [vmem:[#allocation6 + $0x8] sm:$0xff]  ;;  %p184_p2 = scmp.ne.s32.totalorder %s255_s2, %s183_s7  ;;  %p187_p3 = scmp.lt.u32.totalorder %s183_s7, %s255_s2 }
  0x27   :  { %137 = vlog2.f32 %v61_v1 }
  0x28   :  { %p189_p4 = pnand %p187_p3, %p184_p2 }
  0x30   :  { %v136_v3 = vpop.eup %135 }
  0x31   :  { %v138_v5 = vpop.eup %137  ;;  %v65_v6 = vmul.f32 0.6931472, %v136_v3 }
  0x32   :  { %v67_v8 = vmul.f32 0.6931472, %v138_v5 }
  0x33   :  { %v70_v10 = vmul.f32 %v68_v2, %v65_v6 }
  0x34   :  { %v71_v11 = vmul.f32 %v69_v4, %v67_v8 }
  0x35   :  { %v72_v12 = vmul.f32 %v70_v10, %v62_v7 }
  0x36   :  { %v73_v13 = vmul.f32 %v71_v11, %v63_v9 }
  0x37   :  { %v87_v14 = vcombine.high %v72_v12, %v72_v12  ;;  %v92_v15 = vsel %vm91_vm0, %v72_v12, 0.0 }
  0x38   :  { %v88_v16 = vcombine.high %v73_v13, %v73_v13  ;;  %v95_v18 = vsel %vm91_vm0, %v73_v13, 0.0 }
  0x39   :  { %v93_v17 = vsel %vm91_vm0, %v87_v14, 0.0 }
  0x3a   :  { %v94_v19 = vadd.f32 %v93_v17, %v92_v15  ;;  %v97_v20 = vsel %vm91_vm0, %v88_v16, 0.0 }
  0x3c   :  { %v96_v21 = vadd.f32 %v95_v18, %v94_v19 }
  0x3e   :  { %v98_v22 = vadd.f32 %v97_v20, %v96_v21 }
  0x40   :  { %99 = vadd.xlane.f32.xlu0 %v98_v22 }
  0xcd   :  { %v100_v23 = vpop.xlane.xlu0 %99 }
  0xce   :  { %v101_v24 = vrot.slane %v100_v23, 4 }
  0xd0   :  { %v102_v25 = vadd.f32 %v101_v24, %v100_v23 }
  0xd2   :  { %v103_v26 = vrot.slane %v102_v25, 2 }
  0xd4   :  { %v104_v27 = vadd.f32 %v103_v26, %v102_v25 }
  0xd6   :  { %v105_v28 = vrot.slane %v104_v27, 1 }
  0xd8   :  { %v106_v29 = vadd.f32 %v105_v28, %v104_v27 }
  0xda   :  { %130 = vpush %v106_v29 }
 0x10b   :  { %s131_s1 = spop %130 }
 0x10c   :  { %s108_s4 = ssub.f32 0.0, %s131_s1 }
 0x10e   :  { %110 = sst [smem:[#allocation8]] %s108_s4 }
 0x10f   :  { %192 = shalt.err (!%p189_p4)
}
 0x110   :  { %s201_s12 = smov [#allocation8]  }
 0x111   :  { %118 = dma.smem_to_hbm %s201_s12, 16, %s255_s2, [#allocation5]  }
 0x112   :  { %197 = dma.done.wait [#allocation5], 16  }
 0x113   :  { %198 = vsyncadd [#allocation5], 4294967280 }
 0x114   :  { %122 = sfence }
 0x115   :  { %123 = vsyncpa [#allocation4], 1 }
 0x116   :  { %124 = vsyncpa [#allocation7], 1 }
 0x117   :  { %125 = vsyncpa [#allocation5], 1 }

</bundles_post_ra>
